<compile_context>
chip_gen: v7x
topology: tpu7x:2x2x1
jax: 0.10.0
libtpu: 0.0.40
codegen_flags: <defaults>
</compile_context>

<pallas_src>
import jax
import jax.numpy as jnp
from jax.experimental import pallas as pl
from jax.experimental.pallas import tpu as pltpu


# ----------------------------------------------------------------------------- helpers
def _round_up(x, m):
    return ((x + m - 1) // m) * m


# ----------------------------------------------------------------------------- kernel
def _make_kernel(F):
    def kernel(pack_ref, st_ref, w1_ref, w2_ref, vm_ref, ve_ref, out_ref):
        pack = pack_ref[...]                           # (R, 2F+1) = [x | ind | dt]
        x = pack[:, 0:F]
        ind = pack[:, F:2 * F]
        dt = pack[:, 2 * F:2 * F + 1]
        masked = x * ind                               # ConceptEmbedding mask

        # --- TimeEmbeddingLayer: sin(dt * w + phi) -------------------------------
        wt = vm_ref[0:1, :]                            # (1, M)
        phi = vm_ref[1:2, :]                           # (1, M)
        te = jnp.sin(dt * wt + phi)                    # (R, M)

        bias = ve_ref[0:1, :]                          # b_fc @ Ws1 + b_scale
        gamma = ve_ref[1:2, :]
        beta = ve_ref[2:3, :]

        # --- fused (fc -> scale) matmul + static embedding + bias ----------------
        #   ts_emb + st_emb == masked @ (Wfc@Ws1) + te @ Ws2 + (b_fc@Ws1 + b_scale) + st
        h = (jnp.dot(masked, w1_ref[...], preferred_element_type=jnp.float32)
             + jnp.dot(te, w2_ref[...], preferred_element_type=jnp.float32)
             + bias + st_ref[...])                     # (R, E)

        # --- tanh + LayerNorm(eps=1e-12) ------------------------------------------
        h = jnp.tanh(h)
        mean = jnp.mean(h, axis=-1, keepdims=True)
        var = jnp.mean((h - mean) ** 2, axis=-1, keepdims=True)
        y = (h - mean) * jax.lax.rsqrt(var + 1e-12)
        out_ref[...] = y * gamma + beta
        # TODO(synk): nn.Dropout layers are identity at inference time and omitted.
    return kernel


# ----------------------------------------------------------------------------- wrapper
def mamba_embedding_forward(ts_values, ts_indicators, ts_times, static, params,
                            *, row_tile=None):
    B, F, T = ts_values.shape
    E = params["w_fc_t"].shape[1]
    M = params["w_time"].shape[1]
    N = B * T

    # ---- tile choice: single block when N is small; cap at 512 rows so large N
    #      keeps >=2 grid steps (v7x megacore) and VMEM stays tiny (double-
    #      buffered rows are ~512*(2F+1+2E)*4B << default scoped VMEM on all gens).
    if row_tile is None:
        row_tile = min(_round_up(N, 8), 512)
    row_tile = _round_up(row_tile, 8)
    N_pad = _round_up(N, row_tile)

    # ---- one-time algebraic folding of the tiny matmuls (wrapper-side) ----------
    ws_t = params["w_scale_t"]                          # (E+M, E)
    ws1_t, ws2_t = ws_t[:E], ws_t[E:]                   # split concat == split matmuls
    w1 = params["w_fc_t"] @ ws1_t                       # (F, E): fc folded into scale
    bias = params["b_fc"] @ ws1_t + params["b_scale"]   # (E,)
    vec_e = jnp.stack([bias, params["gamma"], params["beta"]])                # (3, E)
    vec_m = jnp.concatenate([params["w_time"], params["phi_time"]], axis=0)   # (2, M)

    # ---- glue (literal PyTorch reshape / time-delta / static embedding) ---------
    x_flat = ts_values.reshape(N, F)                    # == inputs.reshape(-1, F)
    ind_flat = ts_indicators.reshape(N, F)
    dt = jnp.concatenate(
        [jnp.zeros_like(ts_times[:, :1]), ts_times[:, 1:] - ts_times[:, :-1]], axis=-1)
    dt_flat = dt.reshape(N, 1)
    pack = jnp.concatenate([x_flat, ind_flat, dt_flat], axis=-1)      # (N, 2F+1)

    st_emb = static @ params["w_st_t"] + params["b_st"]               # (B, E)
    st_rows = jnp.repeat(st_emb, T, axis=0)                           # (N, E)

    if N_pad != N:
        padding = ((0, N_pad - N), (0, 0))
        pack = jnp.pad(pack, padding)
        st_rows = jnp.pad(st_rows, padding)

    W = 2 * F + 1
    row = lambda w: pl.BlockSpec((row_tile, w), lambda i: (i, 0))
    full = lambda a: pl.BlockSpec(a.shape, lambda i: (0, 0))

    out_flat = pl.pallas_call(
        _make_kernel(F),
        out_shape=jax.ShapeDtypeStruct((N_pad, E), jnp.float32),
        grid=(N_pad // row_tile,),
        in_specs=[
            row(W),            # packed [x | ind | dt]
            row(E),            # precomputed static embedding rows
            full(w1),          # fused (F, E) weight
            full(ws2_t),       # (M, E) time branch weight
            full(vec_m),       # (2, M): w_time, phi_time
            full(vec_e),       # (3, E): fused bias, gamma, beta
        ],
        out_specs=pl.BlockSpec((row_tile, E), lambda i: (i, 0)),
        compiler_params=pltpu.CompilerParams(dimension_semantics=("parallel",)),
    )(pack, st_rows, w1, ws2_t, vec_m, vec_e)

    return out_flat[:N].reshape(B, T, E)


# ----------------------------------------------------------------------------- params
def init_params(key, F, E, M, S):
    ks = jax.random.split(key, 8)

    def linear_w_t(k, fan_in, fan_out):
        bound = 1.0 / jnp.sqrt(fan_in)
        return jax.random.uniform(k, (fan_in, fan_out), jnp.float32, -bound, bound)

    def linear_b(k, fan_in, fan_out):
        bound = 1.0 / jnp.sqrt(fan_in)
        return jax.random.uniform(k, (fan_out,), jnp.float32, -bound, bound)

    def xavier(k, shape):
        bound = jnp.sqrt(6.0 / (shape[0] + shape[1]))
        return jax.random.uniform(k, shape, jnp.float32, -bound, bound)

    return {
        "w_fc_t": linear_w_t(ks[0], F, E),          # ConceptEmbedding.fc
        "b_fc": linear_b(ks[1], F, E),
        "w_time": xavier(ks[2], (1, M)),            # TimeEmbeddingLayer.w
        "phi_time": xavier(ks[3], (1, M)),          # TimeEmbeddingLayer.phi
        "w_scale_t": linear_w_t(ks[4], E + M, E),   # scale_layer
        "b_scale": linear_b(ks[5], E + M, E),
        "w_st_t": linear_w_t(ks[6], S, E),          # StaticEmbedding.fc
        "b_st": linear_b(ks[7], S, E),
        "gamma": jnp.ones((E,), jnp.float32),       # LayerNorm
        "beta": jnp.zeros((E,), jnp.float32),
    }


# ----------------------------------------------------------------------------- reference
def reference_forward(ts_values, ts_indicators, ts_times, static, p):
    """Literal (unfused) JAX transcription of the PyTorch forward."""
    B, F, T = ts_values.shape
    masked = ts_values * ts_indicators
    dt = jnp.concatenate(
        [jnp.zeros_like(ts_times[:, :1]), ts_times[:, 1:] - ts_times[:, :-1]], axis=-1)
    te = jnp.sin(dt[..., None] * p["w_time"] + p["phi_time"])                 # (B,T,M)
    feat = (masked.reshape(-1, F) @ p["w_fc_t"] + p["b_fc"]).reshape(B, T, -1)
    comb = jnp.concatenate([feat, te], axis=-1)
    ts_emb = comb @ p["w_scale_t"] + p["b_scale"]
    st_emb = static @ p["w_st_t"] + p["b_st"]
    h = jnp.tanh(ts_emb + st_emb[:, None, :])
    mean = h.mean(-1, keepdims=True)
    var = ((h - mean) ** 2).mean(-1, keepdims=True)
    return (h - mean) / jnp.sqrt(var + 1e-12) * p["gamma"] + p["beta"]


# ----------------------------------------------------------------------------- main
if __name__ == "__main__":
    B, F, T = 2, 4, 8            # batch, num_features, time_steps
    M = 16                       # max_time_steps (time-embedding size)
    E = 32                       # config.hidden_size
    S = 6                        # static_size

    key = jax.random.PRNGKey(0)
    k_v, k_i, k_t, k_s, k_p = jax.random.split(key, 5)

    ts_values = jax.random.normal(k_v, (B, F, T), jnp.float32)
    ts_indicators = (jax.random.uniform(k_i, (B, F, T)) > 0.3).astype(jnp.float32)
    ts_times = jnp.cumsum(jax.random.uniform(k_t, (B, T), jnp.float32), axis=-1)
    static = jax.random.normal(k_s, (B, S), jnp.float32)

    params = init_params(k_p, F, E, M, S)

    out = mamba_embedding_forward(ts_values, ts_indicators, ts_times, static, params)
    out = jax.block_until_ready(out)

    ref = reference_forward(ts_values, ts_indicators, ts_times, static, params)
    assert out.shape == (B, T, E)
    assert jnp.allclose(out, ref, atol=1e-5, rtol=1e-5), "mismatch vs JAX reference"
    print("KERNEL_OK")
</pallas_src>

<mosaic_0001>
module attributes {stable_mosaic.version = 11 : i64} {
  func.func @kernel(%arg0: i32, %arg1: memref<16x9xf32, #tpu.memory_space<vmem>>, %arg2: memref<16x32xf32, #tpu.memory_space<vmem>>, %arg3: memref<4x32xf32, #tpu.memory_space<vmem>>, %arg4: memref<16x32xf32, #tpu.memory_space<vmem>>, %arg5: memref<2x16xf32, #tpu.memory_space<vmem>>, %arg6: memref<3x32xf32, #tpu.memory_space<vmem>>, %arg7: memref<16x32xf32, #tpu.memory_space<vmem>>) attributes {dimension_semantics = [#tpu.dimension_semantics<parallel>], iteration_bounds = array<i64: 1>, scalar_prefetch = 0 : i64, scratch_operands = 0 : i64, tpu.core_type = #tpu.core_type<tc>, window_params = [{transform_indices = @transform_0, window_bounds = array<i64: 16, 9>}, {transform_indices = @transform_1, window_bounds = array<i64: 16, 32>}, {pipeline_mode = #tpu.pipeline_mode<synchronous>, transform_indices = @transform_2, window_bounds = array<i64: 4, 32>}, {pipeline_mode = #tpu.pipeline_mode<synchronous>, transform_indices = @transform_3, window_bounds = array<i64: 16, 32>}, {pipeline_mode = #tpu.pipeline_mode<synchronous>, transform_indices = @transform_4, window_bounds = array<i64: 2, 16>}, {pipeline_mode = #tpu.pipeline_mode<synchronous>, transform_indices = @transform_5, window_bounds = array<i64: 3, 32>}, {transform_indices = @transform_6, window_bounds = array<i64: 16, 32>}]} {
    %c0 = arith.constant 0 : index
    %c0_0 = arith.constant 0 : index
    %0 = vector.load %arg1[%c0, %c0_0] : memref<16x9xf32, #tpu.memory_space<vmem>>, vector<16x9xf32>
    %1 = vector.extract_strided_slice %0 {offsets = [0, 0], sizes = [16, 4], strides = [1, 1]} : vector<16x9xf32> to vector<16x4xf32>
    %2 = vector.extract_strided_slice %0 {offsets = [0, 4], sizes = [16, 4], strides = [1, 1]} : vector<16x9xf32> to vector<16x4xf32>
    %3 = vector.extract_strided_slice %0 {offsets = [0, 8], sizes = [16, 1], strides = [1, 1]} : vector<16x9xf32> to vector<16x1xf32>
    %4 = arith.mulf %1, %2 : vector<16x4xf32>
    %c0_1 = arith.constant 0 : index
    %c0_2 = arith.constant 0 : index
    %5 = vector.load %arg5[%c0_1, %c0_2] : memref<2x16xf32, #tpu.memory_space<vmem>>, vector<1x16xf32>
    %c1 = arith.constant 1 : index
    %c0_3 = arith.constant 0 : index
    %6 = vector.load %arg5[%c1, %c0_3] : memref<2x16xf32, #tpu.memory_space<vmem>>, vector<1x16xf32>
    %7 = vector.broadcast %3 : vector<16x1xf32> to vector<16x16xf32>
    %8 = vector.broadcast %5 : vector<1x16xf32> to vector<16x16xf32>
    %9 = arith.mulf %7, %8 : vector<16x16xf32>
    %10 = vector.broadcast %6 : vector<1x16xf32> to vector<16x16xf32>
    %11 = arith.addf %9, %10 : vector<16x16xf32>
    %12 = math.sin %11 : vector<16x16xf32>
    %c0_4 = arith.constant 0 : index
    %c0_5 = arith.constant 0 : index
    %13 = vector.load %arg6[%c0_4, %c0_5] : memref<3x32xf32, #tpu.memory_space<vmem>>, vector<1x32xf32>
    %c1_6 = arith.constant 1 : index
    %c0_7 = arith.constant 0 : index
    %14 = vector.load %arg6[%c1_6, %c0_7] : memref<3x32xf32, #tpu.memory_space<vmem>>, vector<1x32xf32>
    %c2 = arith.constant 2 : index
    %c0_8 = arith.constant 0 : index
    %15 = vector.load %arg6[%c2, %c0_8] : memref<3x32xf32, #tpu.memory_space<vmem>>, vector<1x32xf32>
    %c0_9 = arith.constant 0 : index
    %c0_10 = arith.constant 0 : index
    %16 = vector.load %arg3[%c0_9, %c0_10] : memref<4x32xf32, #tpu.memory_space<vmem>>, vector<4x32xf32>
    %cst = arith.constant dense<0.000000e+00> : vector<16x32xf32>
    %17 = tpu.matmul %4, %16, %cst {dimension_numbers = #tpu.dot_dimension_numbers<[1], [0], [0], [1], [0, 0, 1, 1], [], []>} : vector<16x4xf32>, vector<4x32xf32>, vector<16x32xf32> -> vector<16x32xf32>
    %c0_11 = arith.constant 0 : index
    %c0_12 = arith.constant 0 : index
    %18 = vector.load %arg4[%c0_11, %c0_12] : memref<16x32xf32, #tpu.memory_space<vmem>>, vector<16x32xf32>
    %cst_13 = arith.constant dense<0.000000e+00> : vector<16x32xf32>
    %19 = tpu.matmul %12, %18, %cst_13 {dimension_numbers = #tpu.dot_dimension_numbers<[1], [0], [0], [1], [0, 0, 1, 1], [], []>} : vector<16x16xf32>, vector<16x32xf32>, vector<16x32xf32> -> vector<16x32xf32>
    %20 = arith.addf %17, %19 : vector<16x32xf32>
    %21 = vector.broadcast %13 : vector<1x32xf32> to vector<16x32xf32>
    %22 = arith.addf %20, %21 : vector<16x32xf32>
    %c0_14 = arith.constant 0 : index
    %c0_15 = arith.constant 0 : index
    %23 = vector.load %arg2[%c0_14, %c0_15] : memref<16x32xf32, #tpu.memory_space<vmem>>, vector<16x32xf32>
    %24 = arith.addf %22, %23 : vector<16x32xf32>
    %25 = math.tanh %24 : vector<16x32xf32>
    %cst_16 = arith.constant dense<0.000000e+00> : vector<16xf32>
    %26 = vector.multi_reduction <add>, %25, %cst_16 [1] : vector<16x32xf32> to vector<16xf32>
    %27 = vector.shape_cast %26 : vector<16xf32> to vector<16x1xf32>
    %cst_17 = arith.constant 3.200000e+01 : f32
    %28 = vector.broadcast %cst_17 : f32 to vector<16x1xf32>
    %29 = arith.divf %27, %28 : vector<16x1xf32>
    %30 = vector.broadcast %29 : vector<16x1xf32> to vector<16x32xf32>
    %31 = arith.subf %25, %30 : vector<16x32xf32>
    %32 = arith.mulf %31, %31 : vector<16x32xf32>
    %cst_18 = arith.constant dense<0.000000e+00> : vector<16xf32>
    %33 = vector.multi_reduction <add>, %32, %cst_18 [1] : vector<16x32xf32> to vector<16xf32>
    %34 = vector.shape_cast %33 : vector<16xf32> to vector<16x1xf32>
    %cst_19 = arith.constant 3.200000e+01 : f32
    %35 = vector.broadcast %cst_19 : f32 to vector<16x1xf32>
    %36 = arith.divf %34, %35 : vector<16x1xf32>
    %37 = vector.broadcast %29 : vector<16x1xf32> to vector<16x32xf32>
    %38 = arith.subf %25, %37 : vector<16x32xf32>
    %cst_20 = arith.constant 9.99999996E-13 : f32
    %39 = vector.broadcast %cst_20 : f32 to vector<16x1xf32>
    %40 = arith.addf %36, %39 : vector<16x1xf32>
    %41 = math.rsqrt %40 : vector<16x1xf32>
    %42 = vector.broadcast %41 : vector<16x1xf32> to vector<16x32xf32>
    %43 = arith.mulf %38, %42 : vector<16x32xf32>
    %44 = vector.broadcast %14 : vector<1x32xf32> to vector<16x32xf32>
    %45 = arith.mulf %43, %44 : vector<16x32xf32>
    %46 = vector.broadcast %15 : vector<1x32xf32> to vector<16x32xf32>
    %47 = arith.addf %45, %46 : vector<16x32xf32>
    %c0_21 = arith.constant 0 : index
    %c0_22 = arith.constant 0 : index
    %48 = vector.load %arg7[%c0_21, %c0_22] : memref<16x32xf32, #tpu.memory_space<vmem>>, vector<16x32xf32>
    tpu.vector_store %arg7[%c0_21, %c0_22], %47 {strides = array<i32>} : memref<16x32xf32, #tpu.memory_space<vmem>>, vector<16x32xf32>,
    return
  }
  func.func @transform_0(%arg0: i32) -> (i32, i32) {
    %c0_i32 = arith.constant 0 : i32
    %c0_i32_0 = arith.constant 0 : i32
    return %arg0, %c0_i32 : i32, i32
  }
  func.func @transform_1(%arg0: i32) -> (i32, i32) {
    %c0_i32 = arith.constant 0 : i32
    %c0_i32_0 = arith.constant 0 : i32
    return %arg0, %c0_i32 : i32, i32
  }
  func.func @transform_2(%arg0: i32) -> (i32, i32) {
    %c0_i32 = arith.constant 0 : i32
    %c0_i32_0 = arith.constant 0 : i32
    %c0_i32_1 = arith.constant 0 : i32
    return %c0_i32, %c0_i32_0 : i32, i32
  }
  func.func @transform_3(%arg0: i32) -> (i32, i32) {
    %c0_i32 = arith.constant 0 : i32
    %c0_i32_0 = arith.constant 0 : i32
    %c0_i32_1 = arith.constant 0 : i32
    return %c0_i32, %c0_i32_0 : i32, i32
  }
  func.func @transform_4(%arg0: i32) -> (i32, i32) {
    %c0_i32 = arith.constant 0 : i32
    %c0_i32_0 = arith.constant 0 : i32
    %c0_i32_1 = arith.constant 0 : i32
    return %c0_i32, %c0_i32_0 : i32, i32
  }
  func.func @transform_5(%arg0: i32) -> (i32, i32) {
    %c0_i32 = arith.constant 0 : i32
    %c0_i32_0 = arith.constant 0 : i32
    %c0_i32_1 = arith.constant 0 : i32
    return %c0_i32, %c0_i32_0 : i32, i32
  }
  func.func @transform_6(%arg0: i32) -> (i32, i32) {
    %c0_i32 = arith.constant 0 : i32
    %c0_i32_0 = arith.constant 0 : i32
    return %arg0, %c0_i32 : i32, i32
  }
}

</mosaic_0001>

<bundles_post_ra>
// kernel: tpu_custom_call.1
= control target key start
LH: loop header
LB: loop body
LE: loop exit
PB: predicated region body
PF: predicated region fallthrough
CT: control target
= control target key end

     0   :  { %11 = vsyncpa [#allocation3], 0  ;;  %s938_s0 = inlined_call_operand.hbm [shape: f32[16,9], index: 0, kind: input, shape index: {}]   ;;  %s939_s1 = inlined_call_operand.hbm [shape: f32[16,32], index: 1, kind: input, shape index: {}]   ;;  %s940_s2 = inlined_call_operand.vmem [shape: f32[4,32], index: 2, kind: input, shape index: {}]   ;;  %s941_s3 = inlined_call_operand.hbm [shape: f32[16,32], index: 3, kind: input, shape index: {}]   ;;  %s942_s4 = inlined_call_operand.vmem [shape: f32[2,16], index: 4, kind: input, shape index: {}]   ;;  %s943_s5 = inlined_call_operand.vmem [shape: f32[3,32], index: 5, kind: input, shape index: {}]   ;;  %s944_s6 = inlined_call_operand.hbm [shape: f32[16,32], index: 6, kind: output, shape index: {}]  }
   0x1   :  { %12 = vsyncpa [#allocation6], 0 }
   0x2   :  { %13 = vsyncpa [#allocation4], 0  ;;  %s729_s21 = smov [#allocation5]   ;;  %s730_s23 = smov [#allocation2]  }
   0x3   :  { %s31_s22 = sshll.u32 %s729_s21, 4  ;;  %s19_s24 = sshll.u32 %s730_s23, 4  ;;  %s32_s22 = int_to_ptr.vmem [resolvable:$true] %s31_s22  ;;  %s778_s24 = int_to_ptr.vmem [resolvable:$true] %s19_s24 }
   0x4   :  { %s635_s27 = scalar_lea.hbm %s939_s1, 256 }
   0x5   :  { %p636_p0 = scmp.ne.s32.totalorder %s939_s1, %s635_s27  ;;  %p639_p1 = scmp.lt.u32.totalorder %s635_s27, %s939_s1 }
   0x7   :  { %p641_p2 = pnand %p639_p1, %p636_p0 }
   0x9   :  { %644 = shalt.err (!%p641_p2)
}
   0xa   :  { %s645_s8 = scalar_lea.vmem %s32_s22, 256  ;;  %p650_p4 = scmp.lt.s32.totalorder %s32_s22, %s32_s22 }
   0xb   :  { %p646_p3 = scmp.ne.s32.totalorder %s32_s22, %s645_s8  ;;  %p651_p5 = scmp.lt.s32.totalorder %s645_s8, %s645_s8 }
   0xd   :  { %p652_p6 = por %p651_p5, %p650_p4 }
   0xf   :  { %p653_p7 = pnand %p652_p6, %p646_p3 }
  0x11   :  { %656 = shalt.err (!%p653_p7)
}
  0x12   :  { %s731_s9 = smov 128   ;;  %s732_s10 = smov 8  }
  0x13   :  { %37 = dma.hbm_to_vmem [thread:$0]  %s939_s1, 256, %s32_s22, [#allocation6], %s731_s9, %s731_s9, %s732_s10  }
  0x14   :  { %s657_s15 = scalar_lea.hbm %s938_s0, 256 }
  0x15   :  { %p658_p8 = scmp.ne.s32.totalorder %s938_s0, %s657_s15  ;;  %p661_p9 = scmp.lt.u32.totalorder %s657_s15, %s938_s0 }
  0x17   :  { %p663_p10 = pnand %p661_p9, %p658_p8 }
  0x19   :  { %666 = shalt.err (!%p663_p10)
}
  0x1a   :  { %s667_s20 = scalar_lea.vmem %s778_s24, 256  ;;  %p672_p12 = scmp.lt.s32.totalorder %s778_s24, %s778_s24 }
  0x1b   :  { %p668_p11 = scmp.ne.s32.totalorder %s778_s24, %s667_s20  ;;  %p673_p13 = scmp.lt.s32.totalorder %s667_s20, %s667_s20 }
  0x1d   :  { %p674_p0 = por %p673_p13, %p672_p12 }
  0x1f   :  { %p675_p1 = pnand %p674_p0, %p668_p11 }
  0x21   :  { %678 = shalt.err (!%p675_p1)
}
  0x22   :  { %25 = dma.hbm_to_vmem [thread:$0]  %s938_s0, 256, %s778_s24, [#allocation3], %s731_s9, %s731_s9, %s732_s10  }
  0x23   :  { %s733_s22 = smov [#allocation7]   ;;  %s679_s27 = scalar_lea.hbm %s941_s3, 256 }
  0x24   :  { %s45_s23 = sshll.u32 %s733_s22, 4  ;;  %p680_p2 = scmp.ne.s32.totalorder %s941_s3, %s679_s27  ;;  %s46_s23 = int_to_ptr.vmem [resolvable:$true] %s45_s23 }
  0x25   :  { %p683_p3 = scmp.lt.u32.totalorder %s679_s27, %s941_s3 }
  0x27   :  { %p685_p4 = pnand %p683_p3, %p680_p2 }
  0x29   :  { %688 = shalt.err (!%p685_p4)
}
  0x2a   :  { %s689_s8 = scalar_lea.vmem %s46_s23, 256  ;;  %p694_p6 = scmp.lt.s32.totalorder %s46_s23, %s46_s23 }
  0x2b   :  { %p690_p5 = scmp.ne.s32.totalorder %s46_s23, %s689_s8  ;;  %p695_p7 = scmp.lt.s32.totalorder %s689_s8, %s689_s8 }
  0x2d   :  { %p696_p8 = por %p695_p7, %p694_p6 }
  0x2f   :  { %p697_p9 = pnand %p696_p8, %p690_p5 }
  0x31   :  { %700 = shalt.err (!%p697_p9)
}
  0x32   :  { %51 = dma.hbm_to_vmem [thread:$0]  %s941_s3, 256, %s46_s23, [#allocation6], %s731_s9, %s731_s9, %s732_s10  }
  0x33   :  { %723 = dma.done.wait [#allocation3], 256  }
  0x34   :  { %724 = vsyncadd [#allocation3], 4294967040 }
  0x35   :  { %725 = dma.done.wait [#allocation6], 512  }
  0x36   :  { %726 = vsyncadd [#allocation6], 4294966784  ;;  %v734_v0 = vmov 8   ;;  %v65_v1 = vld [vmem:[#allocation2] sm:$0xff]  ;;  %s735_s11 = smov 124   ;;  %v66_v2 = vld [vmem:[#allocation2 + $0x8] sm:$0xff] }
  0x37   :  { %618 = vset.pattern.permute.xlu0 %v734_v0  ;;  %69 = vrot.lane.b32.xlu1 %v65_v1, %s735_s11  ;;  %v311_v3 = vld [vmem:[#allocation7] sm:$0xff]  ;;  %v312_v4 = vld [vmem:[#allocation7 + $0x8] sm:$0xff]  ;;  %vm402_vm0 = vcmask 1043456   ;;  %vm395_vm1 = vcmask 31744   ;;  %v736_v37 = vmov 683565275  }
  0x38   :  { %80 = vperm.xlu0 %618, %v65_v1   ;;  %v590_v5 = vpack.c.bf16 %v312_v4, %v311_v3  ;;  %v310_v6 = vld [vmem:[%s940_s2] sm:$0xf]  ;;  %v737_v40 = vmov 2475754826   ;;  %v738_v42 = vmov 2131351028  }
  0x39   :  { %585 = vmatprep.subr.msk.mxu0 %vm402_vm0, %v310_v6  ;;  %v553_v11 = vld [vmem:[%s942_s4] ss:$0 sm:$0xff]  ;;  %v554_v12 = vld [vmem:[%s942_s4 + $0x1] ss:$0 sm:$0xff]  ;;  %v739_v44 = vmov 2102212464  }
  0x3a   :  { %591 = vmatprep.subr.bf16.mxu1 %v590_v5  ;;  %586 = vmatpush3.msk.msra.mxu0 %vm402_vm0, %v310_v6  ;;  %v740_v49 = vmov 920167782   ;;  %v741_v54 = vmov 1326507024   ;;  %s742_s1 = smov [#allocation8]  }
  0x3b   :  { %71 = vrot.lane.b32.xlu1 %v66_v2, %s735_s11  ;;  %593 = vmatpush3.bf16.msra.mxu1 %v590_v5  ;;  %s540_s21 = sshll.u32 %s742_s1, 4  ;;  %s541_s21 = int_to_ptr.vmem [resolvable:$true] %s540_s21 }
  0x3c   :  { %84 = vperm.xlu0 %618, %v66_v2   ;;  %s701_s22 = scalar_lea.vmem %s541_s21, 256  ;;  %p706_p11 = scmp.lt.s32.totalorder %s541_s21, %s541_s21 }
  0x3d   :  { %p702_p10 = scmp.ne.s32.totalorder %s541_s21, %s701_s22  ;;  %p707_p12 = scmp.lt.s32.totalorder %s701_s22, %s701_s22 }
  0x3f   :  { %p708_p13 = por %p707_p12, %p706_p11 }
  0x41   :  { %p709_p0 = pnand %p708_p13, %p702_p10 }
  0xa9   :  { %v70_v7 = vpop.permute.xlu1 %69 }
  0xaa   :  { %v75_v8 = vmul.f32 %v70_v7, %v65_v1 }
  0xac   :  { %587 = vmatprep.mubr.msk.f32.mxu0 %vm395_vm1, %v75_v8 }
  0xad   :  { %v72_v9 = vpop.permute.xlu1 %71 }
  0xae   :  { %v76_v10 = vmul.f32 %v72_v9, %v66_v2 }
  0xb0   :  { %588 = vmatmul.mubr.msk.f32.vlgmr.msra.gmra.mrb[0].mxu0 %vm395_vm1, %v76_v10 }
  0xb7   :  { %v81_v13 = vpop.permute.xlu0 %80 }
  0xb8   :  { %v91_v14 = vmul.f32 %v553_v11, %v81_v13 }
  0xba   :  { %v839_v15 = vadd.f32 %v554_v12, %v91_v14 }
  0xbb   :  { %v85_v16 = vpop.permute.xlu0 %84 }
  0xbc   :  { %v102_v17 = vand.u32 2139095040, %v839_v15  ;;  %v92_v18 = vmul.f32 %v553_v11, %v85_v16  ;;  %v99_v21 = vand.u32 2147483647, %v839_v15  ;;  %vm101_vm0 = vcmp.lt.s32.totalorder %v839_v15, 0 }
  0xbe   :  { %v103_v19 = vshrl.u32 %v102_v17, 23  ;;  %v842_v20 = vadd.f32 %v554_v12, %v92_v18  ;;  %v106_v27 = vand.u32 8388607, %v99_v21  ;;  %vm100_vm1 = vcmp.le.f32.partialorder %v99_v21, 0.7853982 }
  0xc0   :  { %v555_v22 = vadd.s32 4294967169, %v103_v19  ;;  %v206_v23 = vand.u32 2139095040, %v842_v20  ;;  %v203_v24 = vand.u32 2147483647, %v842_v20  ;;  %v107_v33 = vor.u32 8388608, %v106_v27 }
  0xc2   :  { %v109_v25 = vadd.s32 1, %v555_v22  ;;  %v207_v26 = vshrl.u32 %v206_v23, 23  ;;  %v210_v28 = vand.u32 8388607, %v203_v24  ;;  %v147_v4 = vshll.u32 %v107_v33, 8 }
  0xc4   :  { %vm110_vm2 = vcmp.gt.s32.totalorder %v109_v25, 0  ;;  %v559_v29 = vadd.s32 4294967169, %v207_v26  ;;  %v211_v34 = vor.u32 8388608, %v210_v28 }
  0xc5   :  { %v111_v30 = vsel %vm110_vm2, %v109_v25, 0  ;;  %vm205_vm2 = vcmp.lt.s32.totalorder %v842_v20, 0 }
  0xc6   :  { %v113_v31 = vand.u32 31, %v111_v30  ;;  %v213_v32 = vadd.s32 1, %v559_v29  ;;  %v112_v35 = vshrl.u32 %v111_v30, 5  ;;  %v251_v14 = vshll.u32 %v211_v34, 8 }
  0xc8   :  { %v114_v36 = vsub.s32 32, %v113_v31  ;;  %vm214_vm3 = vcmp.gt.s32.totalorder %v213_v32, 0  ;;  %v116_v38 = vshll.u32 %v736_v37, %v113_v31  ;;  %v119_v41 = vshll.u32 %v737_v40, %v113_v31 }
  0xc9   :  { %v215_v39 = vsel %vm214_vm3, %v213_v32, 0  ;;  %v122_v43 = vshll.u32 %v738_v42, %v113_v31  ;;  %v125_v45 = vshll.u32 %v739_v44, %v113_v31  ;;  %v128_v50 = vshll.u32 %v740_v49, %v113_v31 }
  0xca   :  { %v852_v46 = vshrl.u32 %v215_v39, 5  ;;  %v217_v47 = vand.u32 31, %v215_v39  ;;  %v117_v48 = vshrl.u32 %v737_v40, %v114_v36  ;;  %v120_v51 = vshrl.u32 %v738_v42, %v114_v36 }
  0xcb   :  { %v123_v52 = vshrl.u32 %v739_v44, %v114_v36  ;;  %v126_v53 = vshrl.u32 %v740_v49, %v114_v36  ;;  %v129_v55 = vshrl.u32 %v741_v54, %v114_v36  ;;  %v115_v59 = vshrl.u32 %v736_v37, %v114_v36 }
  0xcc   :  { %v218_v56 = vsub.s32 32, %v217_v47  ;;  %v229_v57 = vshll.u32 %v739_v44, %v217_v47  ;;  %v232_v58 = vshll.u32 %v740_v49, %v217_v47  ;;  %v118_v60 = vor.u32 %v117_v48, %v116_v38 }
  0xcd   :  { %v121_v61 = vor.u32 %v120_v51, %v119_v41  ;;  %v124_v62 = vor.u32 %v123_v52, %v122_v43  ;;  %v127_v63 = vor.u32 %v126_v53, %v125_v45  ;;  %v130_v2 = vor.u32 %v129_v55, %v128_v50 }
  0xce   :  { %v230_v0 = vshrl.u32 %v740_v49, %v218_v56  ;;  %v233_v1 = vshrl.u32 %v741_v54, %v218_v56  ;;  %vm131_vm4 = vcmp.lt.s32.totalorder %v112_v35, 1  ;;  %vm133_vm5 = vcmp.lt.s32.totalorder %v112_v35, 3 }
  0xcf   :  { %vm134_vm6 = vcmp.lt.s32.totalorder %v112_v35, 4  ;;  %v135_v3 = vsel %vm131_vm4, %v115_v59, %v118_v60  ;;  %v139_v8 = vsel %vm131_vm4, %v118_v60, %v121_v61  ;;  %v143_v11 = vsel %vm131_vm4, %v121_v61, %v124_v62 }
  0xd0   :  { %v231_v5 = vor.u32 %v230_v0, %v229_v57  ;;  %v234_v6 = vor.u32 %v233_v1, %v232_v58  ;;  %v136_v7 = vsel %vm134_vm6, %v124_v62, 2102212464  ;;  %v140_v10 = vsel %vm134_vm6, %v127_v63, 920167782 }
  0xd1   :  { %v137_v9 = vsel %vm133_vm5, %v121_v61, %v136_v7  ;;  %v144_v12 = vsel %vm134_vm6, %v130_v2, 1326507024  ;;  %vm238_vm7 = vcmp.lt.s32.totalorder %v852_v46, 4  ;;  %vm132_vm8 = vcmp.lt.s32.totalorder %v112_v35, 2 }
  0xd2   :  { %v141_v13 = vsel %vm133_vm5, %v124_v62, %v140_v10  ;;  %v244_v16 = vsel %vm238_vm7, %v231_v5, 920167782  ;;  %v248_v17 = vsel %vm238_vm7, %v234_v6, 1326507024  ;;  %v145_v19 = vsel %vm133_vm5, %v127_v63, %v144_v12 }
  0xd3   :  { %v142_v18 = vsel %vm132_vm8, %v139_v8, %v141_v13  ;;  %v138_v22 = vsel %vm132_vm8, %v135_v3, %v137_v9  ;;  %v146_v23 = vsel %vm132_vm8, %v143_v11, %v145_v19  ;;  %v220_v29 = vshll.u32 %v736_v37, %v217_v47 }
  0xd4   :  { %v863_v25 = vmul.u32.u64.low %v147_v4, %v142_v18  ;;  %v864_v26 = vmul.u32.u64.high %v147_v4, %v142_v18, %v863_v25  ;;  %v866_v27 = vmul.u32.u64.low %v147_v4, %v146_v23  ;;  %v867_v28 = vmul.u32.u64.high %v147_v4, %v146_v23, %v866_v27 }
  0xd5   :  { %v221_v30 = vshrl.u32 %v737_v40, %v218_v56  ;;  %v223_v31 = vshll.u32 %v737_v40, %v217_v47  ;;  %v224_v32 = vshrl.u32 %v738_v42, %v218_v56  ;;  %v226_v33 = vshll.u32 %v738_v42, %v217_v47 }
  0xd6   :  { %v227_v34 = vshrl.u32 %v739_v44, %v218_v56  ;;  %v154_v36 = vmul.u32 %v147_v4, %v138_v22  ;;  %v219_v38 = vshrl.u32 %v736_v37, %v218_v56  ;;  %vm235_vm9 = vcmp.lt.s32.totalorder %v852_v46, 1 }
  0xd7   :  { %v222_v35 = vor.u32 %v221_v30, %v220_v29  ;;  %v157_v39 = vadd.s32 1, %v864_v26  ;;  %v225_v41 = vor.u32 %v224_v32, %v223_v31  ;;  %vm237_vm10 = vcmp.lt.s32.totalorder %v852_v46, 3 }
  0xd8   :  { %v228_v43 = vor.u32 %v227_v34, %v226_v33  ;;  %vm156_vm11 = vc.u32 %v867_v28, %v863_v25  ;;  %vm236_vm12 = vcmp.lt.s32.totalorder %v852_v46, 2  ;;  %v249_v42 = vsel %vm237_vm10, %v231_v5, %v248_v17 }
  0xd9   :  { %v239_v40 = vsel %vm235_vm9, %v219_v38, %v222_v35  ;;  %v158_v44 = vsel %vm156_vm11, %v157_v39, %v864_v26  ;;  %v243_v45 = vsel %vm235_vm9, %v222_v35, %v225_v41  ;;  %v155_v11 = vadd.s32 %v863_v25, %v867_v28 }
  0xda   :  { %v240_v37 = vsel %vm238_vm7, %v228_v43, 2102212464  ;;  %v245_v47 = vsel %vm237_vm10, %v228_v43, %v244_v16  ;;  %v159_v48 = vadd.s32 %v158_v44, %v154_v36  ;;  %v247_v51 = vsel %vm235_vm9, %v225_v41, %v228_v43 }
  0xdb   :  { %v241_v49 = vsel %vm237_vm10, %v225_v41, %v240_v37  ;;  %v246_v50 = vsel %vm236_vm12, %v243_v45, %v245_v47  ;;  %v250_v52 = vsel %vm236_vm12, %v247_v51, %v249_v42  ;;  %vm204_vm3 = vcmp.le.f32.partialorder %v203_v24, 0.7853982 }
  0xdc   :  { %v885_v53 = vmul.u32.u64.low %v251_v14, %v246_v50  ;;  %v886_v54 = vmul.u32.u64.high %v251_v14, %v246_v50, %v885_v53  ;;  %v160_v55 = vadd.s32 536870912, %v159_v48  ;;  %v242_v58 = vsel %vm236_vm12, %v239_v40, %v241_v49 }
  0xdd   :  { %v888_v56 = vmul.u32.u64.low %v251_v14, %v250_v52  ;;  %v889_v57 = vmul.u32.u64.high %v251_v14, %v250_v52, %v888_v56  ;;  %v258_v62 = vmul.u32 %v251_v14, %v242_v58  ;;  %vm313_vm7 = vcmask 130048  }
  0xde   :  { %v161_v59 = vshrl.u32 %v160_v55, 30  ;;  %v261_v60 = vadd.s32 1, %v886_v54  ;;  %vm191_vm8 = vweird.f32 %v839_v15  ;;  %vm295_vm12 = vweird.f32 %v842_v20 }
  0xdf   :  { %vm260_vm13 = vc.u32 %v889_v57, %v885_v53  ;;  %v259_v32 = vadd.s32 %v885_v53, %v889_v57 }
  0xe0   :  { %v162_v61 = vshll.u32 %v161_v59, 30  ;;  %v262_v63 = vsel %vm260_vm13, %v261_v60, %v886_v54  ;;  %v185_v28 = vsub.s32 4, %v161_v59  ;;  %vm493_vm13 = vcmask 261120  }
  0xe1   :  { %v263_v0 = vadd.s32 %v262_v63, %v258_v62 }
  0xe2   :  { %v163_v46 = vsub.s32 %v159_v48, %v162_v61  ;;  %v186_v42 = vsel %vm101_vm0, %v185_v28, %v161_v59 }
  0xe3   :  { %v264_v2 = vadd.s32 536870912, %v263_v0  ;;  %v188_v45 = vsel %vm100_vm1, 0, %v186_v42 }
  0xe4   :  { %v165_v1 = vsub.s32 0, %v163_v46  ;;  %v192_v51 = vadd.s32 3, %v188_v45  ;;  %v569_v45 = vld [vmem:[%s943_s5 + $0x1] ss:$0 sm:$0xff] }
  0xe5   :  { %v265_v4 = vshrl.u32 %v264_v2, 30 }
  0xe6   :  { %v556_v3 = vmin.u32 %v165_v1, %v163_v46  ;;  %v193_v54 = vand.u32 3, %v192_v51 }
  0xe7   :  { %v266_v6 = vshll.u32 %v265_v4, 30  ;;  %v289_v50 = vsub.s32 4, %v265_v4 }
  0xe8   :  { %v167_v5 = vclz %v556_v3  ;;  %vm198_vm4 = vcmp.eq.s32.totalorder %v193_v54, 2  ;;  %vm195_vm5 = vcmp.eq.s32.totalorder %v193_v54, 0  ;;  %vm194_vm6 = vcmp.lt.s32.totalorder %v193_v54, 2 }
  0xe9   :  { %v267_v8 = vsub.s32 %v263_v0, %v266_v6  ;;  %v290_v53 = vsel %vm205_vm2, %v289_v50, %v265_v4 }
  0xea   :  { %v557_v7 = vadd.s32 4294967294, %v167_v5  ;;  %v292_v57 = vsel %vm204_vm3, 0, %v290_v53 }
  0xeb   :  { %v269_v10 = vsub.s32 0, %v267_v8  ;;  %v296_v62 = vadd.s32 3, %v292_v57 }
  0xec   :  { %vm558_vm14 = vcmp.lt.s32.totalorder %v557_v7, 0 }
  0xed   :  { %v170_v9 = vsel %vm558_vm14, 0, %v557_v7  ;;  %v560_v14 = vmin.u32 %v269_v10, %v267_v8  ;;  %v297_v0 = vand.u32 3, %v296_v62  ;;  %v568_v10 = vld [vmem:[%s943_s5] ss:$0 sm:$0xff] }
  0xee   :  { %v171_v12 = vsub.s32 32, %v170_v9  ;;  %v175_v13 = vsub.s32 4294967266, %v170_v9  ;;  %v172_v16 = vshll.u32 %v163_v46, %v170_v9 }
  0xef   :  { %v271_v19 = vclz %v560_v14  ;;  %vm302_vm9 = vcmp.eq.s32.totalorder %v297_v0, 2  ;;  %vm299_vm10 = vcmp.eq.s32.totalorder %v297_v0, 0  ;;  %vm298_vm11 = vcmp.lt.s32.totalorder %v297_v0, 2  ;;  %v488_v14 = vld [vmem:[#allocation5 + $0x8] sm:$0xff] }
  0xf0   :  { %v173_v17 = vshrl.u32 %v155_v11, %v171_v12  ;;  %v176_v18 = vadd.s32 127, %v175_v13 }
  0xf1   :  { %v561_v26 = vadd.s32 4294967294, %v271_v19 }
  0xf2   :  { %v174_v22 = vor.u32 %v173_v17, %v172_v16  ;;  %v177_v23 = vshll.u32 %v176_v18, 23  ;;  %v487_v18 = vld [vmem:[#allocation5] sm:$0xff] }
  0xf3   :  { %vm562_vm15 = vcmp.lt.s32.totalorder %v561_v26, 0 }
  0xf4   :  { %v178_v27 = vor.u32 4788187, %v177_v23  ;;  %v181_v30 = vcvt.s32.f32 %v174_v22  ;;  %v274_v31 = vsel %vm562_vm15, 0, %v561_v26 }
  0xf5   :  { %v275_v33 = vsub.s32 32, %v274_v31  ;;  %v279_v34 = vsub.s32 4294967266, %v274_v31  ;;  %v276_v36 = vshll.u32 %v267_v8, %v274_v31 }
  0xf6   :  { %v179_v29 = vand.u32 2147483647, %v178_v27 }
  0xf7   :  { %v277_v38 = vshrl.u32 %v259_v32, %v275_v33  ;;  %v280_v35 = vadd.s32 127, %v279_v34 }
  0xf8   :  { %v182_v25 = vmul.f32 %v181_v30, %v179_v29 }
  0xf9   :  { %v278_v41 = vor.u32 %v277_v38, %v276_v36  ;;  %v281_v43 = vshll.u32 %v280_v35, 23 }
  0xfa   :  { %v183_v39 = vxor.u32 2147483648, %v182_v25 }
  0xfb   :  { %v282_v37 = vor.u32 4788187, %v281_v43  ;;  %v285_v48 = vcvt.s32.f32 %v278_v41 }
  0xfc   :  { %v184_v40 = vsel %vm101_vm0, %v183_v39, %v182_v25 }
  0xfd   :  { %v187_v44 = vsel %vm100_vm1, %v839_v15, %v184_v40  ;;  %v283_v47 = vand.u32 2147483647, %v282_v37 }
  0xfe   :  { %619 = vcosq.f32 %v187_v44 }
  0xff   :  { %621 = vsinq.f32 %v187_v44  ;;  %v286_v49 = vmul.f32 %v285_v48, %v283_v47  ;;  %v570_v48 = vld [vmem:[%s943_s5 + $0x2] ss:$0 sm:$0xff] }
 0x101   :  { %v287_v52 = vxor.u32 2147483648, %v286_v49 }
 0x103   :  { %v288_v21 = vsel %vm205_vm2, %v287_v52, %v286_v49 }
 0x104   :  { %v291_v55 = vsel %vm204_vm3, %v842_v20, %v288_v21 }
 0x105   :  { %623 = vcosq.f32 %v291_v55 }
 0x106   :  { %625 = vsinq.f32 %v291_v55 }
 0x108   :  { %v620_v56 = vpop.eup %619 }
 0x109   :  { %v622_v58 = vpop.eup %621  ;;  %v199_v59 = vxor.u32 2147483648, %v620_v56 }
 0x10a   :  { %v196_v60 = vxor.u32 2147483648, %v622_v58 }
 0x10b   :  { %v200_v61 = vsel %vm198_vm4, %v199_v59, %v622_v58 }
 0x10c   :  { %v197_v63 = vsel %vm195_vm5, %v620_v56, %v196_v60 }
 0x10d   :  { %v201_v24 = vsel %vm194_vm6, %v197_v63, %v200_v61 }
 0x10e   :  { %v202_v46 = vsel %vm191_vm8, nan, %v201_v24 }
 0x10f   :  { %582 = vmatprep.mubr.msk.f32.mxu1 %vm313_vm7, %v202_v46  ;;  %v624_v1 = vpop.eup %623 }
 0x110   :  { %v626_v2 = vpop.eup %625  ;;  %v303_v3 = vxor.u32 2147483648, %v624_v1 }
 0x111   :  { %v300_v4 = vxor.u32 2147483648, %v626_v2 }
 0x112   :  { %v304_v5 = vsel %vm302_vm9, %v303_v3, %v626_v2 }
 0x113   :  { %v301_v6 = vsel %vm299_vm10, %v624_v1, %v300_v4 }
 0x114   :  { %v305_v7 = vsel %vm298_vm11, %v301_v6, %v304_v5 }
 0x115   :  { %v306_v8 = vsel %vm295_vm12, nan, %v305_v7 }
 0x116   :  { %583 = vmatmul.mubr.msk.f32.vlgmr.msra.gmra.mrb[0].mxu1 %vm313_vm7, %v306_v8 }
 0x183   :  { %v589_v15 = vpop.f32.mrb[0].mxu0 }
 0x184   :  { %v472_v9 = vpop.f32.mrb[1].mxu0 }
 0x1e9   :  { %v584_v11 = vpop.f32.mrb[0].mxu1 }
 0x1ea   :  { %v478_v12 = vadd.f32 %v589_v15, %v584_v11  ;;  %v386_v13 = vpop.f32.mrb[1].mxu1 }
 0x1eb   :  { %v473_v16 = vadd.f32 %v472_v9, %v386_v13 }
 0x1ec   :  { %v486_v17 = vadd.f32 %v568_v10, %v478_v12 }
 0x1ed   :  { %v485_v19 = vadd.f32 %v568_v10, %v473_v16 }
 0x1ee   :  { %v490_v22 = vadd.f32 %v488_v14, %v486_v17 }
 0x1ef   :  { %v489_v20 = vadd.f32 %v487_v18, %v485_v19 }
 0x1f0   :  { %627 = vtanh.f32 %v490_v22 }
 0x1f1   :  { %629 = vtanh.f32 %v489_v20 }
 0x1fa   :  { %v628_v23 = vpop.eup %627 }
 0x1fb   :  { %v630_v26 = vpop.eup %629  ;;  %v497_v27 = vsel %vm493_vm13, %v628_v23, 0.0 }
 0x1fc   :  { %498 = vadd.xlane.f32.xlu1 %v497_v27  ;;  %v494_v29 = vsel %vm493_vm13, %v630_v26, 0.0 }
 0x1fd   :  { %495 = vadd.xlane.f32.xlu0 %v494_v29 }
 0x289   :  { %v499_v30 = vpop.xlane.xlu1 %498 }
 0x28a   :  { %v502_v31 = vmul.f32 0.03125, %v499_v30  ;;  %v496_v32 = vpop.xlane.xlu0 %495 }
 0x28b   :  { %v501_v33 = vmul.f32 0.03125, %v496_v32 }
 0x28c   :  { %v504_v34 = vsub.f32 %v628_v23, %v502_v31 }
 0x28d   :  { %v503_v25 = vsub.f32 %v630_v26, %v501_v33 }
 0x28e   :  { %v506_v38 = vmul.f32 %v504_v34, %v504_v34 }
 0x28f   :  { %v505_v28 = vmul.f32 %v503_v25, %v503_v25 }
 0x290   :  { %v510_v35 = vsel %vm493_vm13, %v506_v38, 0.0 }
 0x291   :  { %v507_v36 = vsel %vm493_vm13, %v505_v28, 0.0 }
 0x292   :  { %508 = vadd.xlane.f32.xlu0 %v507_v36 }
 0x296   :  { %511 = vadd.xlane.f32.xlu0 %v510_v35 }
 0x31f   :  { %v509_v39 = vpop.xlane.xlu0 %508 }
 0x320   :  { %v513_v41 = vmul.f32 0.03125, %v509_v39 }
 0x322   :  { %v515_v43 = vadd.f32 1e-12, %v513_v41 }
 0x323   :  { %v512_v40 = vpop.xlane.xlu0 %511 }
 0x324   :  { %631 = vrsqrt.f32 %v515_v43  ;;  %v514_v42 = vmul.f32 0.03125, %v512_v40 }
 0x326   :  { %v516_v44 = vadd.f32 1e-12, %v514_v42 }
 0x328   :  { %633 = vrsqrt.f32 %v516_v44 }
 0x32e   :  { %v632_v37 = vpop.eup %631 }
 0x32f   :  { %v519_v47 = vmul.f32 %v632_v37, %v503_v25 }
 0x331   :  { %v525_v49 = vmul.f32 %v569_v45, %v519_v47 }
 0x332   :  { %v634_v50 = vpop.eup %633 }
 0x333   :  { %v520_v51 = vmul.f32 %v634_v50, %v504_v34  ;;  %v531_v52 = vadd.f32 %v570_v48, %v525_v49 }
 0x335   :  { %v526_v21 = vmul.f32 %v569_v45, %v520_v51  ;;  %533 = vst.msk [vmem:[#allocation8] sm:$0xff] %vm493_vm13, %v531_v52 }
 0x337   :  { %v532_v53 = vadd.f32 %v570_v48, %v526_v21 }
 0x339   :  { %534 = vst.msk [vmem:[#allocation8 + $0x8] sm:$0xff] %vm493_vm13, %v532_v53 }
 0x33a   :  { %712 = shalt.err (!%p709_p0)
}
 0x33b   :  { %s713_s25 = scalar_lea.hbm %s944_s6, 256 }
 0x33c   :  { %p714_p1 = scmp.ne.s32.totalorder %s944_s6, %s713_s25  ;;  %p717_p2 = scmp.lt.u32.totalorder %s713_s25, %s944_s6 }
 0x33e   :  { %p719_p3 = pnand %p717_p2, %p714_p1 }
 0x340   :  { %722 = shalt.err (!%p719_p3)
}
 0x341   :  { %546 = dma.vmem_to_hbm [thread:$0]  %s541_s21, 256, %s944_s6, [#allocation4], %s731_s9, %s731_s9, %s732_s10  }
 0x342   :  { %727 = dma.done.wait [#allocation4], 256  }
 0x343   :  { %728 = vsyncadd [#allocation4], 4294967040 }
 0x344   :  { %550 = vsyncpa [#allocation3], 1 }
 0x345   :  { %551 = vsyncpa [#allocation6], 1 }
 0x346   :  { %552 = vsyncpa [#allocation4], 1 }

</bundles_post_ra>
